<compile_context>
chip_gen: v6e
topology: v6e:2x2x1
jax: 0.10.0
libtpu: 0.0.40
codegen_flags: <defaults>
</compile_context>

<pallas_src>
import functools

import jax
import jax.numpy as jnp
from jax.experimental import pallas as pl
from jax.experimental.pallas import tpu as pltpu

K_IN = 784        # 28 * 28 (contraction dim for fc1, unpadded)
H = 128           # hidden width
N_OUT = 10        # logits
N_OUT_PAD = 128   # lane-dense padded logits


def mlp_kernel(x_ref, w1_ref, b1_ref, w2_ref, b2_ref, w3_ref, b3_ref, o_ref):
    # x arrives as f32 straight from HBM; bf16 cast for the MXU happens here
    # (VPU work, free relative to the DMA that binds this kernel).
    x = x_ref[...].astype(jnp.bfloat16)
    # fc1 + relu (bf16 operands, f32 accumulate)
    h = jnp.dot(x, w1_ref[...], preferred_element_type=jnp.float32)
    h = jnp.maximum(h + b1_ref[...], 0.0).astype(jnp.bfloat16)
    # fc2 + relu
    h = jnp.dot(h, w2_ref[...], preferred_element_type=jnp.float32)
    h = jnp.maximum(h + b2_ref[...], 0.0).astype(jnp.bfloat16)
    # fc3 (logits, padded to 128 lanes; no activation)
    o_ref[...] = (
        jnp.dot(h, w3_ref[...], preferred_element_type=jnp.float32) + b3_ref[...]
    )


def _round_up(n, m):
    return ((n + m - 1) // m) * m


def _choose_tile(b, tile_b_max):
    """Batch tile: multiple of 128 (8 for tiny b), >= 2 grid steps when b allows
    (v7x dual-TC megacore), minimal last-tile overrun."""
    if b <= 256:
        return _round_up(b, 8)
    tile = min(tile_b_max, _round_up(pl.cdiv(b, 2), 128))  # >= 2 steps
    tile = max(128, (tile // 128) * 128)
    num_tiles = pl.cdiv(b, tile)
    return _round_up(pl.cdiv(b, num_tiles), 128)


@functools.partial(jax.jit, static_argnames=("tile_b",))
def simple_mlp_forward(x_nchw, params, *, tile_b=1024):
    """x_nchw: (B, ...) with prod(...) == 784. Returns (B, 10) float32 logits."""
    B = x_nchw.shape[0]
    x = x_nchw.reshape(B, -1).astype(jnp.float32)  # flatten(1); metadata-only reshape
    assert x.shape[1] == K_IN

    w1, b1, w2, b2, w3, b3 = params

    # Weights to bf16 for the MXU (tiny, one-time); biases stay f32.
    w1_b = w1.astype(jnp.bfloat16)
    b1_f = b1.astype(jnp.float32)
    w2_b = w2.astype(jnp.bfloat16)
    b2_f = b2.astype(jnp.float32)
    # Pad logits dim 10 -> 128 so the output store is lane-dense (unmasked vst).
    w3_p = jnp.pad(w3.astype(jnp.float32),
                   ((0, 0), (0, N_OUT_PAD - N_OUT))).astype(jnp.bfloat16)
    b3_p = jnp.pad(b3.astype(jnp.float32), ((0, 0), (0, N_OUT_PAD - N_OUT)))

    tile = _choose_tile(B, tile_b)
    num_tiles = pl.cdiv(B, tile)
    grid = (num_tiles,)

    # Triple-buffer the x stream only when there are enough steps to benefit.
    if num_tiles >= 3:
        x_spec = pl.BlockSpec((tile, K_IN), lambda i: (i, 0),
                              pipeline_mode=pl.Buffered(3))
    else:
        x_spec = pl.BlockSpec((tile, K_IN), lambda i: (i, 0))

    out = pl.pallas_call(
        mlp_kernel,
        out_shape=jax.ShapeDtypeStruct((B, N_OUT_PAD), jnp.float32),
        grid=grid,
        in_specs=[
            x_spec,                                           # x tile (pipelined)
            pl.BlockSpec((K_IN, H), lambda i: (0, 0)),        # w1 (resident)
            pl.BlockSpec((1, H), lambda i: (0, 0)),           # b1
            pl.BlockSpec((H, H), lambda i: (0, 0)),           # w2
            pl.BlockSpec((1, H), lambda i: (0, 0)),           # b2
            pl.BlockSpec((H, N_OUT_PAD), lambda i: (0, 0)),   # w3 (padded)
            pl.BlockSpec((1, N_OUT_PAD), lambda i: (0, 0)),   # b3 (padded)
        ],
        out_specs=pl.BlockSpec((tile, N_OUT_PAD), lambda i: (i, 0)),
        compiler_params=pltpu.CompilerParams(
            dimension_semantics=("parallel",),
            vmem_limit_bytes=32 * 1024 * 1024,
        ),
    )(x, w1_b, b1_f, w2_b, b2_f, w3_p, b3_p)

    return out[:, :N_OUT]


def init_params(key):
    """Deterministic init mimicking torch.nn.Linear default (uniform +/- 1/sqrt(fan_in)).
    Weights stored as (in_features, out_features) so y = x @ W + b matches torch's
    x @ W.T + b."""
    def linear(key, fan_in, fan_out):
        kw, kb = jax.random.split(key)
        bound = 1.0 / jnp.sqrt(fan_in)
        w = jax.random.uniform(kw, (fan_in, fan_out), jnp.float32, -bound, bound)
        b = jax.random.uniform(kb, (1, fan_out), jnp.float32, -bound, bound)
        return w, b

    k1, k2, k3 = jax.random.split(key, 3)
    w1, b1 = linear(k1, K_IN, H)
    w2, b2 = linear(k2, H, H)
    w3, b3 = linear(k3, H, N_OUT)
    return (w1, b1, w2, b2, w3, b3)


if __name__ == "__main__":
    key = jax.random.PRNGKey(0)
    kx, kp = jax.random.split(key)

    # Small MNIST-like batch: (B=8, C=1, H=28, W=28) -> flatten to (8, 784)
    B = 8
    x = jax.random.normal(kx, (B, 1, 28, 28), dtype=jnp.float32)
    params = init_params(kp)

    out = simple_mlp_forward(x, params)
    jax.block_until_ready(out)
    assert out.shape == (B, N_OUT)

    # Cross-check against a plain-JAX f32 reference (kernel uses bf16 MXU
    # operands with f32 accumulation, so allow a small tolerance).
    xf = x.reshape(B, -1)
    w1, b1, w2, b2, w3, b3 = params
    ref = jnp.maximum(xf @ w1 + b1, 0.0)
    ref = jnp.maximum(ref @ w2 + b2, 0.0)
    ref = ref @ w3 + b3
    assert jnp.allclose(out, ref, atol=3e-2, rtol=2e-2), (
        f"max abs diff {jnp.max(jnp.abs(out - ref))}"
    )

    print("KERNEL_OK")
</pallas_src>

<mosaic_0001>
module attributes {stable_mosaic.version = 11 : i64} {
  func.func @mlp_kernel(%arg0: i32, %arg1: memref<8x784xf32, #tpu.memory_space<vmem>>, %arg2: memref<784x128xbf16, #tpu.memory_space<vmem>>, %arg3: memref<1x128xf32, #tpu.memory_space<vmem>>, %arg4: memref<128x128xbf16, #tpu.memory_space<vmem>>, %arg5: memref<1x128xf32, #tpu.memory_space<vmem>>, %arg6: memref<128x128xbf16, #tpu.memory_space<vmem>>, %arg7: memref<1x128xf32, #tpu.memory_space<vmem>>, %arg8: memref<8x128xf32, #tpu.memory_space<vmem>>) attributes {dimension_semantics = [#tpu.dimension_semantics<parallel>], iteration_bounds = array<i64: 1>, scalar_prefetch = 0 : i64, scratch_operands = 0 : i64, tpu.core_type = #tpu.core_type<tc>, window_params = [{transform_indices = @transform_0, window_bounds = array<i64: 8, 784>}, {pipeline_mode = #tpu.pipeline_mode<synchronous>, transform_indices = @transform_1, window_bounds = array<i64: 784, 128>}, {pipeline_mode = #tpu.pipeline_mode<synchronous>, transform_indices = @transform_2, window_bounds = array<i64: 1, 128>}, {pipeline_mode = #tpu.pipeline_mode<synchronous>, transform_indices = @transform_3, window_bounds = array<i64: 128, 128>}, {pipeline_mode = #tpu.pipeline_mode<synchronous>, transform_indices = @transform_4, window_bounds = array<i64: 1, 128>}, {pipeline_mode = #tpu.pipeline_mode<synchronous>, transform_indices = @transform_5, window_bounds = array<i64: 128, 128>}, {pipeline_mode = #tpu.pipeline_mode<synchronous>, transform_indices = @transform_6, window_bounds = array<i64: 1, 128>}, {transform_indices = @transform_7, window_bounds = array<i64: 8, 128>}]} {
    %c0 = arith.constant 0 : index
    %c0_0 = arith.constant 0 : index
    %0 = vector.load %arg1[%c0, %c0_0] : memref<8x784xf32, #tpu.memory_space<vmem>>, vector<8x784xf32>
    %1 = arith.truncf %0 : vector<8x784xf32> to vector<8x784xbf16>
    %c0_1 = arith.constant 0 : index
    %c0_2 = arith.constant 0 : index
    %2 = vector.load %arg2[%c0_1, %c0_2] : memref<784x128xbf16, #tpu.memory_space<vmem>>, vector<784x128xbf16>
    %cst = arith.constant dense<0.000000e+00> : vector<8x128xf32>
    %3 = tpu.matmul %1, %2, %cst {dimension_numbers = #tpu.dot_dimension_numbers<[1], [0], [0], [1], [0, 0, 1, 1], [], []>} : vector<8x784xbf16>, vector<784x128xbf16>, vector<8x128xf32> -> vector<8x128xf32>
    %c0_3 = arith.constant 0 : index
    %c0_4 = arith.constant 0 : index
    %4 = vector.load %arg3[%c0_3, %c0_4] : memref<1x128xf32, #tpu.memory_space<vmem>>, vector<1x128xf32>
    %5 = vector.broadcast %4 : vector<1x128xf32> to vector<8x128xf32>
    %6 = arith.addf %3, %5 : vector<8x128xf32>
    %cst_5 = arith.constant 0.000000e+00 : f32
    %7 = vector.broadcast %cst_5 : f32 to vector<8x128xf32>
    %8 = arith.maximumf %6, %7 : vector<8x128xf32>
    %9 = arith.truncf %8 : vector<8x128xf32> to vector<8x128xbf16>
    %c0_6 = arith.constant 0 : index
    %c0_7 = arith.constant 0 : index
    %10 = vector.load %arg4[%c0_6, %c0_7] : memref<128x128xbf16, #tpu.memory_space<vmem>>, vector<128x128xbf16>
    %cst_8 = arith.constant dense<0.000000e+00> : vector<8x128xf32>
    %11 = tpu.matmul %9, %10, %cst_8 {dimension_numbers = #tpu.dot_dimension_numbers<[1], [0], [0], [1], [0, 0, 1, 1], [], []>} : vector<8x128xbf16>, vector<128x128xbf16>, vector<8x128xf32> -> vector<8x128xf32>
    %c0_9 = arith.constant 0 : index
    %c0_10 = arith.constant 0 : index
    %12 = vector.load %arg5[%c0_9, %c0_10] : memref<1x128xf32, #tpu.memory_space<vmem>>, vector<1x128xf32>
    %13 = vector.broadcast %12 : vector<1x128xf32> to vector<8x128xf32>
    %14 = arith.addf %11, %13 : vector<8x128xf32>
    %cst_11 = arith.constant 0.000000e+00 : f32
    %15 = vector.broadcast %cst_11 : f32 to vector<8x128xf32>
    %16 = arith.maximumf %14, %15 : vector<8x128xf32>
    %17 = arith.truncf %16 : vector<8x128xf32> to vector<8x128xbf16>
    %c0_12 = arith.constant 0 : index
    %c0_13 = arith.constant 0 : index
    %18 = vector.load %arg6[%c0_12, %c0_13] : memref<128x128xbf16, #tpu.memory_space<vmem>>, vector<128x128xbf16>
    %cst_14 = arith.constant dense<0.000000e+00> : vector<8x128xf32>
    %19 = tpu.matmul %17, %18, %cst_14 {dimension_numbers = #tpu.dot_dimension_numbers<[1], [0], [0], [1], [0, 0, 1, 1], [], []>} : vector<8x128xbf16>, vector<128x128xbf16>, vector<8x128xf32> -> vector<8x128xf32>
    %c0_15 = arith.constant 0 : index
    %c0_16 = arith.constant 0 : index
    %20 = vector.load %arg7[%c0_15, %c0_16] : memref<1x128xf32, #tpu.memory_space<vmem>>, vector<1x128xf32>
    %21 = vector.broadcast %20 : vector<1x128xf32> to vector<8x128xf32>
    %22 = arith.addf %19, %21 : vector<8x128xf32>
    %c0_17 = arith.constant 0 : index
    %c0_18 = arith.constant 0 : index
    %23 = vector.load %arg8[%c0_17, %c0_18] : memref<8x128xf32, #tpu.memory_space<vmem>>, vector<8x128xf32>
    tpu.vector_store %arg8[%c0_17, %c0_18], %22 {strides = array<i32>} : memref<8x128xf32, #tpu.memory_space<vmem>>, vector<8x128xf32>,
    return
  }
  func.func @transform_0(%arg0: i32) -> (i32, i32) {
    %c0_i32 = arith.constant 0 : i32
    %c0_i32_0 = arith.constant 0 : i32
    return %arg0, %c0_i32 : i32, i32
  }
  func.func @transform_1(%arg0: i32) -> (i32, i32) {
    %c0_i32 = arith.constant 0 : i32
    %c0_i32_0 = arith.constant 0 : i32
    %c0_i32_1 = arith.constant 0 : i32
    return %c0_i32, %c0_i32_0 : i32, i32
  }
  func.func @transform_2(%arg0: i32) -> (i32, i32) {
    %c0_i32 = arith.constant 0 : i32
    %c0_i32_0 = arith.constant 0 : i32
    %c0_i32_1 = arith.constant 0 : i32
    return %c0_i32, %c0_i32_0 : i32, i32
  }
  func.func @transform_3(%arg0: i32) -> (i32, i32) {
    %c0_i32 = arith.constant 0 : i32
    %c0_i32_0 = arith.constant 0 : i32
    %c0_i32_1 = arith.constant 0 : i32
    return %c0_i32, %c0_i32_0 : i32, i32
  }
  func.func @transform_4(%arg0: i32) -> (i32, i32) {
    %c0_i32 = arith.constant 0 : i32
    %c0_i32_0 = arith.constant 0 : i32
    %c0_i32_1 = arith.constant 0 : i32
    return %c0_i32, %c0_i32_0 : i32, i32
  }
  func.func @transform_5(%arg0: i32) -> (i32, i32) {
    %c0_i32 = arith.constant 0 : i32
    %c0_i32_0 = arith.constant 0 : i32
    %c0_i32_1 = arith.constant 0 : i32
    return %c0_i32, %c0_i32_0 : i32, i32
  }
  func.func @transform_6(%arg0: i32) -> (i32, i32) {
    %c0_i32 = arith.constant 0 : i32
    %c0_i32_0 = arith.constant 0 : i32
    %c0_i32_1 = arith.constant 0 : i32
    return %c0_i32, %c0_i32_0 : i32, i32
  }
  func.func @transform_7(%arg0: i32) -> (i32, i32) {
    %c0_i32 = arith.constant 0 : i32
    %c0_i32_0 = arith.constant 0 : i32
    return %arg0, %c0_i32 : i32, i32
  }
}

</mosaic_0001>

<bundles_post_ra>
// kernel: simple_mlp_forward.1
= control target key start
LH: loop header
LB: loop body
LE: loop exit
PB: predicated region body
PF: predicated region fallthrough
CT: control target
= control target key end

     0   :  { %v1137_v44 = vmov 0.0   ;;  %vm1138_vm0 = vmmov 0   ;;  %vm441_vm1 = vcmask 130048   ;;  %s1431_s0 = inlined_call_operand.vmem [shape: f32[8,784], index: 0, kind: input, shape index: {}]   ;;  %s1432_s1 = inlined_call_operand.vmem [shape: bf16[784,128], index: 1, kind: input, shape index: {}]   ;;  %s1433_s2 = inlined_call_operand.vmem [shape: f32[1,128], index: 2, kind: input, shape index: {}]   ;;  %s1434_s3 = inlined_call_operand.vmem [shape: bf16[128,128], index: 3, kind: input, shape index: {}]   ;;  %s1435_s4 = inlined_call_operand.vmem [shape: f32[1,128], index: 4, kind: input, shape index: {}]   ;;  %s1436_s5 = inlined_call_operand.vmem [shape: bf16[128,128], index: 5, kind: input, shape index: {}]   ;;  %s1437_s6 = inlined_call_operand.vmem [shape: f32[1,128], index: 6, kind: input, shape index: {}]   ;;  %s1438_s7 = inlined_call_operand.hbm [shape: f32[8,128], index: 7, kind: output, shape index: {}]  }
   0x1   :  { %v1050_v0 = vld [vmem:[%s1432_s1 + $0x78] sm:$0xff]   ;;  %v1054_v4 = vld [vmem:[%s1432_s1 + $0x70] sm:$0xff]   ;;  %v1058_v8 = vld [vmem:[%s1432_s1 + $0x68] sm:$0xff]  }
   0x2   :  { %v1051_v1 = vld [vmem:[%s1432_s1 + $0x38] sm:$0xff]   ;;  %915 = vmatprep.subr.bf16.mxu0 %v1050_v0  ;;  %v1055_v5 = vld [vmem:[%s1432_s1 + $0x30] sm:$0xff]   ;;  %v1059_v9 = vld [vmem:[%s1432_s1 + $0x28] sm:$0xff]  }
   0x3   :  { %v1052_v2 = vld [vmem:[%s1432_s1 + $0xf8] sm:$0xff]   ;;  %916 = vmatpush3.bf16.msra.mxu0 %v1051_v1  ;;  %v1056_v6 = vld [vmem:[%s1432_s1 + $0xf0] sm:$0xff]   ;;  %v1060_v10 = vld [vmem:[%s1432_s1 + $0xe8] sm:$0xff]  }
   0x4   :  { %v1053_v3 = vld [vmem:[%s1432_s1 + $0xb8] sm:$0xff]   ;;  %937 = vmatprep.subr.bf16.mxu1 %v1052_v2  ;;  %917 = vmatprep.subr.bf16.mxu0 %v1054_v4  ;;  %v1057_v7 = vld [vmem:[%s1432_s1 + $0xb0] sm:$0xff]   ;;  %v1061_v11 = vld [vmem:[%s1432_s1 + $0xa8] sm:$0xff]  }
   0x5   :  { %938 = vmatpush3.bf16.msra.mxu1 %v1053_v3  ;;  %v1062_v12 = vld [vmem:[%s1432_s1 + $0x60] sm:$0xff]   ;;  %v1066_v16 = vld [vmem:[%s1432_s1 + $0x58] sm:$0xff]   ;;  %v1070_v20 = vld [vmem:[%s1432_s1 + $0x50] sm:$0xff]  }
   0x6   :  { %939 = vmatprep.subr.bf16.mxu1 %v1056_v6  ;;  %v1063_v13 = vld [vmem:[%s1432_s1 + $0x20] sm:$0xff]   ;;  %v1067_v17 = vld [vmem:[%s1432_s1 + $0x18] sm:$0xff]   ;;  %v1071_v21 = vld [vmem:[%s1432_s1 + $0x10] sm:$0xff]  }
   0x7   :  { %918 = vmatpush3.bf16.msra.mxu0 %v1055_v5  ;;  %v1064_v14 = vld [vmem:[%s1432_s1 + $0xe0] sm:$0xff]   ;;  %v1068_v18 = vld [vmem:[%s1432_s1 + $0xd8] sm:$0xff]   ;;  %v1072_v22 = vld [vmem:[%s1432_s1 + $0xd0] sm:$0xff]  }
   0x8   :  { %919 = vmatprep.subr.bf16.mxu0 %v1058_v8  ;;  %v1065_v15 = vld [vmem:[%s1432_s1 + $0xa0] sm:$0xff]   ;;  %v1069_v19 = vld [vmem:[%s1432_s1 + $0x98] sm:$0xff]   ;;  %v1073_v23 = vld [vmem:[%s1432_s1 + $0x90] sm:$0xff]  }
   0x9   :  { %940 = vmatpush3.bf16.msra.mxu1 %v1057_v7  ;;  %v1074_v24 = vld [vmem:[%s1432_s1 + $0x48] sm:$0xff]   ;;  %v1078_v28 = vld [vmem:[%s1432_s1 + $0x40] sm:$0xff]   ;;  %v1082_v36 = vld [vmem:[%s1432_s1 + $0x178] sm:$0xff]  }
   0xa   :  { %941 = vmatprep.subr.bf16.mxu1 %v1060_v10  ;;  %v1075_v25 = vld [vmem:[%s1432_s1 + $0x8] sm:$0xff]   ;;  %v1079_v29 = vld [vmem:[%s1432_s1] sm:$0xff]   ;;  %v31_v37 = vld [vmem:[%s1431_s0 + $0x18] sm:$0xff] }
   0xb   :  { %920 = vmatpush3.bf16.msra.mxu0 %v1059_v9  ;;  %v1076_v26 = vld [vmem:[%s1432_s1 + $0xc8] sm:$0xff]   ;;  %v1080_v30 = vld [vmem:[%s1432_s1 + $0xc0] sm:$0xff]   ;;  %v38_v38 = vpack.c.bf16 %v31_v37, %v31_v37  ;;  %v1083_v39 = vld [vmem:[%s1432_s1 + $0x138] sm:$0xff]  }
   0xc   :  { %921 = vmatprep.subr.bf16.mxu0 %v1062_v12  ;;  %v1077_v27 = vld [vmem:[%s1432_s1 + $0x88] sm:$0xff]   ;;  %v1081_v33 = vld [vmem:[%s1432_s1 + $0x80] sm:$0xff]   ;;  %v30_v40 = vld [vmem:[%s1431_s0 + $0x10] sm:$0xff] }
   0xd   :  { %942 = vmatpush3.bf16.msra.mxu1 %v1061_v11  ;;  %v29_v31 = vld [vmem:[%s1431_s0 + $0x8] sm:$0xff]  ;;  %v28_v34 = vld [vmem:[%s1431_s0] sm:$0xff]  ;;  %517 = vmatprep.mubr.bf16.mxu1 %v38_v38  ;;  %v37_v41 = vpack.c.bf16 %v30_v40, %v30_v40  ;;  %v1084_v42 = vld [vmem:[%s1432_s1 + $0x170] sm:$0xff]  }
   0xe   :  { %943 = vmatprep.subr.bf16.mxu1 %v1064_v14  ;;  %v36_v32 = vpack.c.bf16 %v29_v31, %v29_v31  ;;  %v35_v35 = vpack.c.bf16 %v28_v34, %v28_v34  ;;  %v1085_v43 = vld [vmem:[%s1432_s1 + $0x130] sm:$0xff]   ;;  %v1086_v45 = vld [vmem:[%s1432_s1 + $0x168] sm:$0xff]   ;;  %v1088_v47 = vld [vmem:[%s1432_s1 + $0x160] sm:$0xff]  }
   0xf   :  { %922 = vmatpush3.bf16.msra.mxu0 %v1063_v13  ;;  %v1087_v46 = vld [vmem:[%s1432_s1 + $0x128] sm:$0xff]   ;;  %v1089_v48 = vld [vmem:[%s1432_s1 + $0x120] sm:$0xff]   ;;  %v1090_v49 = vld [vmem:[%s1432_s1 + $0x158] sm:$0xff]  }
  0x10   :  { %923 = vmatprep.subr.bf16.mxu0 %v1066_v16  ;;  %477 = vmatprep.mubr.bf16.mxu0 %v36_v32  ;;  %v1091_v50 = vld [vmem:[%s1432_s1 + $0x118] sm:$0xff]   ;;  %v1092_v51 = vld [vmem:[%s1432_s1 + $0x150] sm:$0xff]   ;;  %v1098_v53 = vld [vmem:[%s1432_s1 + $0x180] sm:$0xff]  }
  0x11   :  { %944 = vmatpush3.bf16.msra.mxu1 %v1065_v15  ;;  %v1093_v52 = vld [vmem:[%s1432_s1 + $0x110] sm:$0xff]   ;;  %v33_v54 = vld [vmem:[%s1431_s0 + $0x28] sm:$0xff]  ;;  %v1096_v60 = vld [vmem:[%s1432_s1 + $0x140] sm:$0xff]  }
  0x12   :  { %945 = vmatprep.subr.bf16.mxu1 %v1068_v18  ;;  %v1094_v55 = vld [vmem:[%s1432_s1 + $0x148] sm:$0xff]   ;;  %v40_v56 = vpack.c.bf16 %v33_v54, %v33_v54  ;;  %v34_v57 = vld [vmem:[%s1431_s0 + $0x30] sm:$0xff]  ;;  %v1097_v61 = vld [vmem:[%s1432_s1 + $0x100] sm:$0xff]  }
  0x13   :  { %924 = vmatpush3.bf16.msra.mxu0 %v1067_v17  ;;  %v41_v58 = vpack.c.bf16 %v34_v57, %v34_v57  ;;  %v1095_v59 = vld [vmem:[%s1432_s1 + $0x108] sm:$0xff]   ;;  %v32_v62 = vld [vmem:[%s1431_s0 + $0x20] sm:$0xff] }
  0x14   :  { %925 = vmatprep.subr.bf16.mxu0 %v1070_v20 }
  0x15   :  { %946 = vmatpush3.bf16.msra.mxu1 %v1069_v19 }
  0x16   :  { %947 = vmatprep.subr.bf16.mxu1 %v1072_v22 }
  0x17   :  { %926 = vmatpush3.bf16.msra.mxu0 %v1071_v21 }
  0x18   :  { %927 = vmatprep.subr.bf16.mxu0 %v1074_v24 }
  0x19   :  { %948 = vmatpush3.bf16.msra.mxu1 %v1073_v23 }
  0x1a   :  { %949 = vmatprep.subr.bf16.mxu1 %v1076_v26 }
  0x1b   :  { %928 = vmatpush3.bf16.msra.mxu0 %v1075_v25 }
  0x1c   :  { %929 = vmatprep.subr.bf16.mxu0 %v1078_v28 }
  0x1d   :  { %950 = vmatpush3.bf16.msra.mxu1 %v1077_v27 }
  0x1e   :  { %951 = vmatprep.subr.bf16.mxu1 %v1080_v30 }
  0x1f   :  { %930 = vmatpush3.bf16.msra.mxu0 %v1079_v29 }
  0x20   :  { %959 = vmatprep.subr.bf16.mxu0 %v1082_v36 }
  0x21   :  { %952 = vmatpush3.bf16.msra.mxu1 %v1081_v33 }
  0x22   :  { %478 = vmatmul.mubr.bf16.vlgmr.msra.gmra.mxu0 %v35_v35  ;;  %1001 = vmatprep.subr.bf16.mxu1 %v1137_v44 }
  0x23   :  { %960 = vmatpush3.bf16.msra.mxu0 %v1083_v39  ;;  %557 = vmatprep.mubr.bf16.mxu0 %v40_v56 }
  0x24   :  { %518 = vmatmul.mubr.bf16.vlgmr.msra.gmra.mxu1 %v37_v41  ;;  %961 = vmatprep.subr.bf16.mxu0 %v1084_v42 }
  0x25   :  { %1003 = vmatprep.mubr.msk.bf16.mxu1 %vm1138_vm0, %v1137_v44  ;;  %1002 = vmatpush3.bf16.msra.mxu1 %v1098_v53 }
  0x26   :  { %1007 = vmatprep.subr.bf16.mxu1 %v1137_v44 }
  0x27   :  { %962 = vmatpush3.bf16.msra.mxu0 %v1085_v43 }
  0x28   :  { %963 = vmatprep.subr.bf16.mxu0 %v1086_v45 }
  0x2b   :  { %964 = vmatpush3.bf16.msra.mxu0 %v1087_v46 }
  0x2c   :  { %965 = vmatprep.subr.bf16.mxu0 %v1088_v47  ;;  %1004 = vmatmul.mubr.msk.bf16.vlgmr.msra.gmra.mxu1 %vm441_vm1, %v41_v58 }
  0x2d   :  { %1023 = vmatprep.mubr.msk.bf16.mxu1 %vm1138_vm0, %v1137_v44 }
  0x2f   :  { %966 = vmatpush3.bf16.msra.mxu0 %v1089_v48 }
  0x30   :  { %967 = vmatprep.subr.bf16.mxu0 %v1090_v49 }
  0x33   :  { %968 = vmatpush3.bf16.msra.mxu0 %v1091_v50 }
  0x34   :  { %969 = vmatprep.subr.bf16.mxu0 %v1092_v51 }
  0x37   :  { %970 = vmatpush3.bf16.msra.mxu0 %v1093_v52 }
  0x38   :  { %971 = vmatprep.subr.bf16.mxu0 %v1094_v55 }
  0x3b   :  { %972 = vmatpush3.bf16.msra.mxu0 %v1095_v59 }
  0x3c   :  { %973 = vmatprep.subr.bf16.mxu0 %v1096_v60 }
  0x3d   :  { %12 = vsyncpa [#allocation3], 0  ;;  %v39_v63 = vpack.c.bf16 %v32_v62, %v32_v62  ;;  %v1099_v0 = vld [vmem:[%s1434_s3 + $0x38] sm:$0xff]   ;;  %v1100_v1 = vld [vmem:[%s1434_s3 + $0x30] sm:$0xff]   ;;  %s1139_s30 = smov [#allocation2]  }
  0x3e   :  { %1008 = vmatpush3.bf16.msra.mxu1 %v1099_v0  ;;  %v1101_v2 = vld [vmem:[%s1434_s3 + $0x28] sm:$0xff]   ;;  %v1102_v3 = vld [vmem:[%s1434_s3 + $0x20] sm:$0xff]   ;;  %v1103_v4 = vld [vmem:[%s1434_s3 + $0x18] sm:$0xff]   ;;  %s838_s8 = sshll.u32 %s1139_s30, 4  ;;  %s839_s8 = int_to_ptr.vmem [resolvable:$true] %s838_s8 }
  0x3f   :  { %974 = vmatpush3.bf16.msra.mxu0 %v1097_v61  ;;  %1009 = vmatprep.subr.bf16.mxu1 %v1137_v44  ;;  %v1104_v5 = vld [vmem:[%s1434_s3 + $0x10] sm:$0xff]   ;;  %v1105_v6 = vld [vmem:[%s1434_s3 + $0x8] sm:$0xff]   ;;  %v1106_v7 = vld [vmem:[%s1434_s3] sm:$0xff]   ;;  %p1120_p1 = scmp.lt.s32.totalorder %s839_s8, %s839_s8 }
  0x40   :  { %1027 = vmatprep.subr.bf16.mxu0 %v1137_v44  ;;  %v1107_v8 = vld [vmem:[%s1436_s5 + $0x38] sm:$0xff]   ;;  %v1108_v9 = vld [vmem:[%s1436_s5 + $0x30] sm:$0xff]   ;;  %v1109_v10 = vld [vmem:[%s1436_s5 + $0x28] sm:$0xff]  }
  0x41   :  { %v1110_v11 = vld [vmem:[%s1436_s5 + $0x20] sm:$0xff]   ;;  %v1111_v12 = vld [vmem:[%s1436_s5 + $0x18] sm:$0xff]   ;;  %v1112_v13 = vld [vmem:[%s1436_s5 + $0x10] sm:$0xff]  }
  0x42   :  { %558 = vmatmul.mubr.bf16.vlgmr.msra.gmra.mxu0 %v39_v63  ;;  %1010 = vmatpush3.bf16.msra.mxu1 %v1100_v1  ;;  %v846_v27 = vld [vmem:[%s1433_s2] ss:$0 sm:$0xff]  ;;  %v1113_v40 = vld [vmem:[%s1436_s5 + $0x8] sm:$0xff]  }
  0x43   :  { %1043 = vmatprep.mubr.msk.bf16.mxu0 %vm1138_vm0, %v1137_v44  ;;  %1011 = vmatprep.subr.bf16.mxu1 %v1137_v44  ;;  %v1114_v41 = vld [vmem:[%s1436_s5] sm:$0xff]  }
  0x44   :  { %1028 = vmatpush3.bf16.msra.mxu0 %v1107_v8  ;;  %v897_v42 = vld [vmem:[%s1435_s4] ss:$0 sm:$0xff]  ;;  %s1115_s4 = scalar_lea.vmem %s839_s8, 128 }
  0x45   :  { %1029 = vmatprep.subr.bf16.mxu0 %v1137_v44  ;;  %p1116_p0 = scmp.ne.s32.totalorder %s839_s8, %s1115_s4  ;;  %p1121_p2 = scmp.lt.s32.totalorder %s1115_s4, %s1115_s4 }
  0x46   :  { %1012 = vmatpush3.bf16.msra.mxu1 %v1101_v2 }
  0x47   :  { %1013 = vmatprep.subr.bf16.mxu1 %v1137_v44  ;;  %p1122_p3 = por %p1121_p2, %p1120_p1 }
  0x48   :  { %1030 = vmatpush3.bf16.msra.mxu0 %v1108_v9 }
  0x49   :  { %1031 = vmatprep.subr.bf16.mxu0 %v1137_v44  ;;  %p1123_p4 = pnand %p1122_p3, %p1116_p0 }
  0x4a   :  { %1014 = vmatpush3.bf16.msra.mxu1 %v1102_v3 }
  0x4b   :  { %1015 = vmatprep.subr.bf16.mxu1 %v1137_v44 }
  0x4c   :  { %1032 = vmatpush3.bf16.msra.mxu0 %v1109_v10 }
  0x4d   :  { %1033 = vmatprep.subr.bf16.mxu0 %v1137_v44 }
  0x4e   :  { %1016 = vmatpush3.bf16.msra.mxu1 %v1103_v4 }
  0x4f   :  { %1017 = vmatprep.subr.bf16.mxu1 %v1137_v44 }
  0x50   :  { %1034 = vmatpush3.bf16.msra.mxu0 %v1110_v11 }
  0x51   :  { %1035 = vmatprep.subr.bf16.mxu0 %v1137_v44 }
  0x52   :  { %1018 = vmatpush3.bf16.msra.mxu1 %v1104_v5 }
  0x53   :  { %1019 = vmatprep.subr.bf16.mxu1 %v1137_v44 }
  0x54   :  { %1036 = vmatpush3.bf16.msra.mxu0 %v1111_v12 }
  0x55   :  { %1037 = vmatprep.subr.bf16.mxu0 %v1137_v44 }
  0x56   :  { %1020 = vmatpush3.bf16.msra.mxu1 %v1105_v6 }
  0x57   :  { %1021 = vmatprep.subr.bf16.mxu1 %v1137_v44 }
  0x58   :  { %1038 = vmatpush3.bf16.msra.mxu0 %v1112_v13 }
  0x59   :  { %1039 = vmatprep.subr.bf16.mxu0 %v1137_v44 }
  0x5a   :  { %1022 = vmatpush3.bf16.msra.mxu1 %v1106_v7 }
  0x5c   :  { %1040 = vmatpush3.bf16.msra.mxu0 %v1113_v40 }
  0x5d   :  { %1041 = vmatprep.subr.bf16.mxu0 %v1137_v44  ;;  %v906_v44 = vld [vmem:[%s1437_s6] ss:$0 sm:$0xff] }
  0x60   :  { %1042 = vmatpush3.bf16.msra.mxu0 %v1114_v41 }
  0xe2   :  { %v931_v14 = vpop.f32.mrf.mxu0 }
  0xe4   :  { %v932_v15 = vpop.f32.mrf.mxu0  ;;  %v953_v16 = vpop.f32.mrf.mxu1 }
  0xe5   :  { %v933_v26 = vadd.f32 %v932_v15, %v931_v14 }
  0xe6   :  { %v934_v17 = vpop.f32.mrf.mxu0  ;;  %v954_v18 = vpop.f32.mrf.mxu1 }
  0xe7   :  { %v480_v28 = vadd.f32 %v933_v26, %v846_v27  ;;  %v955_v29 = vadd.f32 %v954_v18, %v953_v16 }
  0xe8   :  { %v935_v19 = vpop.f32.mrf.mxu0  ;;  %v956_v20 = vpop.f32.mrf.mxu1 }
  0xe9   :  { %v520_v32 = vadd.f32 %v955_v29, %v480_v28 }
  0xea   :  { %v957_v21 = vpop.f32.mrf.mxu1 }
  0xec   :  { %v599_v22 = vpop.f32.mrf.mxu1 }
  0xee   :  { %v1005_v23 = vpop.f32.mrf.mxu1 }
  0xf0   :  { %v602_v24 = vpop.f32.mrf.mxu1 }
  0xf2   :  { %v1006_v25 = vpop.f32.mrf.mxu1 }
 0x102   :  { %v975_v30 = vpop.f32.mrf.mxu0 }
 0x104   :  { %v976_v31 = vpop.f32.mrf.mxu0 }
 0x105   :  { %v977_v33 = vadd.f32 %v976_v31, %v975_v30 }
 0x106   :  { %v978_v34 = vpop.f32.mrf.mxu0 }
 0x107   :  { %v560_v35 = vadd.f32 %v977_v33, %v520_v32 }
 0x108   :  { %v979_v36 = vpop.f32.mrf.mxu0 }
 0x109   :  { %v600_v37 = vadd.f32 %v599_v22, %v560_v35 }
 0x10b   :  { %v605_v38 = vmax.f32 %v600_v37, 0.0 }
 0x10d   :  { %v606_v39 = vpack.c.bf16 %v605_v38, %v605_v38 }
 0x10f   :  { %1024 = vmatmul.mubr.bf16.vlgmr.msra.gmra.mxu1 %v606_v39 }
 0x1cf   :  { %v712_v43 = vpop.f32.mrf.mxu1 }
 0x1d0   :  { %v713_v45 = vadd.f32 %v897_v42, %v712_v43 }
 0x1d1   :  { %v1025_v46 = vpop.f32.mrf.mxu1 }
 0x1d2   :  { %v718_v47 = vmax.f32 %v713_v45, 0.0 }
 0x1d3   :  { %v715_v48 = vpop.f32.mrf.mxu1 }
 0x1d4   :  { %v719_v49 = vpack.c.bf16 %v718_v47, %v718_v47 }
 0x1d5   :  { %v1026_v50 = vpop.f32.mrf.mxu1 }
 0x1d6   :  { %1044 = vmatmul.mubr.bf16.vlgmr.msra.gmra.mxu0 %v719_v49 }
 0x296   :  { %v825_v51 = vpop.f32.mrf.mxu0 }
 0x297   :  { %v826_v52 = vadd.f32 %v906_v44, %v825_v51 }
 0x298   :  { %v1045_v53 = vpop.f32.mrf.mxu0 }
 0x299   :  { %831 = vst [vmem:[#allocation2] sm:$0xff] %v826_v52 }
 0x29a   :  { %v828_v54 = vpop.f32.mrf.mxu0 }
 0x29b   :  { %1126 = shalt.err (!%p1123_p4)
}
 0x29c   :  { %841 = dma.vmem_to_hbm [thread:$0]  %s839_s8, 128, %s1438_s7, [#allocation3]   ;;  %v1046_v55 = vpop.f32.mrf.mxu0 }
 0x29d   :  { %1135 = dma.done.wait [#allocation3], 128  }
 0x29e   :  { %1136 = vsyncadd [#allocation3], 4294967168 }
 0x29f   :  { %845 = vsyncpa [#allocation3], 1 }

</bundles_post_ra>
